<compile_context>
chip_gen: v7x
topology: tpu7x:2x2x1
jax: 0.10.0
libtpu: 0.0.40
codegen_flags: <defaults>
</compile_context>

<pallas_src>
import jax
import jax.numpy as jnp
from jax import lax
from jax.experimental import pallas as pl
from jax.experimental.pallas import tpu as pltpu


# ---------------------------------------------------------------------------
# Pass 1: per-batch sequence sums of x (pure streaming reduction at HBM-read roofline).
# Grid = (P, B, nN/P); output block (1, 1, C) is resident across the "arbitrary" j axis.
# ---------------------------------------------------------------------------
def _seq_sum_kernel(x_ref, sum_ref):
    @pl.when(pl.program_id(2) == 0)
    def _():
        sum_ref[...] = jnp.zeros_like(sum_ref)

    # (TN, C) tile summed over the sequence rows in f32 (safe for bf16 inputs).
    sum_ref[0] += jnp.sum(x_ref[0].astype(jnp.float32), axis=0, keepdims=True)


# ---------------------------------------------------------------------------
# Pass 2: streaming main kernel — per (TN, C) tile:
#   h   = x @ (0.5*wC) + ab                      (TN, H)
#   out = h @ (s0*wB + s1*wD) + b_eff + x        (TN, C)
# Gate scalars s0/s1 come from SMEM; wB/wD/wC are constant-index (loaded once).
# ---------------------------------------------------------------------------
def _adapter_kernel(gate_ref, x_ref, wc_ref, wb_ref, wd_ref, ab_ref, beff_ref, o_ref):
    b = pl.program_id(0)
    s0 = gate_ref[b, 0]
    s1 = gate_ref[b, 1]

    x = x_ref[0].astype(jnp.float32)                                   # (TN, C)
    h = jnp.dot(x, wc_ref[...],
                precision=lax.Precision.HIGHEST,
                preferred_element_type=jnp.float32) + ab_ref[0]        # (TN, H)
    w_eff = s0 * wb_ref[...] + s1 * wd_ref[...]                        # (H, C)  tiny VPU op
    y = jnp.dot(h, w_eff,
                precision=lax.Precision.HIGHEST,
                preferred_element_type=jnp.float32)                    # (TN, C)
    o_ref[0] = (y + beff_ref[0] + x).astype(o_ref.dtype)


# ---------------------------------------------------------------------------
# Helpers
# ---------------------------------------------------------------------------
def grouped_conv_weight_to_dense(w, groups):
    """w: (out_ch, in_ch_per_group) -> dense (out_ch, in_ch) block-diagonal (exact)."""
    out_ch, in_pg = w.shape
    in_ch = in_pg * groups
    og = out_ch // groups
    dense = jnp.zeros((out_ch, in_ch), w.dtype)
    for g in range(groups):
        dense = dense.at[g * og:(g + 1) * og, g * in_pg:(g + 1) * in_pg].set(
            w[g * og:(g + 1) * og])
    return dense


def _vmem_limit_bytes():
    """Generation-aware VMEM budget: ~40 MiB on v7x (64 MiB/TC), ~80 MiB on v5e/v6e."""
    cap = 64 * 1024 * 1024
    try:
        cap = int(getattr(pltpu.get_tpu_info(), "vmem_capacity_bytes", cap))
    except Exception:
        pass
    return max(16 * 1024 * 1024, min((cap * 5) // 8, 96 * 1024 * 1024))


def _seq_tile_target(c, itemsize, vmem_limit):
    """Rows per tile such that double-buffered x/out tiles + f32 temporaries fit."""
    bytes_per_row = c * (4 * itemsize + 12)
    return max(8, min(2048, (vmem_limit // 2) // max(bytes_per_row, 1)))


def _pick_seq_tile(n, target, align):
    """Largest divisor of n that is a multiple of `align` and <= target, else n."""
    target = max(int(target), 1)
    if n <= target:
        return n
    hi = min(target, n)
    for cand in range(hi - hi % align, align - 1, -align):
        if n % cand == 0:
            return cand
    if align > 8:
        for cand in range(hi - hi % 8, 7, -8):
            if n % cand == 0:
                return cand
    return n   # full-sequence block fallback (see TODO at top)


# ---------------------------------------------------------------------------
# Public wrapper
# ---------------------------------------------------------------------------
def pia_adapter_attn(x, question_mask, raw, *, groups=2, scale=1.0, t=10.0, seq_tile=None):
    """x: (B, N, C). raw: PyTorch-layout weights. Returns (B, N, C) in x.dtype."""
    # TODO(synk): training branch (mask-weighted means + stochastic dropout) not implemented;
    # question_mask is unused on the eval / start_pos=True path.
    del question_mask

    B, N, C = x.shape
    H = raw["wA"].shape[0]
    f32 = jnp.float32
    scale = float(scale)
    t = float(t)

    # --- kernel-ready weights (all tiny; kept in f32 regardless of x dtype) ---
    wa_t = raw["wA"].astype(f32).T                                   # (C, H)
    wc_half = 0.5 * raw["wC"].astype(f32).T                          # (C, H)  folds dropout*0.5
    bh = (raw["bA"] + raw["bC"]).astype(f32)                         # (H,)
    wb_k = grouped_conv_weight_to_dense(raw["wB"].astype(f32), groups).T   # (H, C)
    wd_k = grouped_conv_weight_to_dense(raw["wD"].astype(f32), groups).T   # (H, C)
    bB = raw["bB"].astype(f32)
    bD = raw["bD"].astype(f32)
    wE = raw["wE"].astype(f32)                                       # (2, C)
    bE = raw["bE"].astype(f32)                                       # (2,)

    # --- tiling (generation-aware) ---
    itemsize = jnp.dtype(x.dtype).itemsize
    vmem_cap = _vmem_limit_bytes()
    row_align = 16 if itemsize < 4 else 8
    target = seq_tile if seq_tile is not None else _seq_tile_target(C, itemsize, vmem_cap)
    TN = _pick_seq_tile(N, target, row_align)
    nN = N // TN
    P = 2 if (nN >= 2 and nN % 2 == 0) else 1       # v7x: second core helps pass 1 at small B
    nNp = nN // P

    # ---- pass 1: per-batch (partial) sequence sums of x ----
    sums = pl.pallas_call(
        _seq_sum_kernel,
        out_shape=jax.ShapeDtypeStruct((B, P, C), f32),
        grid_spec=pltpu.PrefetchScalarGridSpec(
            num_scalar_prefetch=0,
            grid=(P, B, nNp),
            in_specs=[pl.BlockSpec((1, TN, C), lambda p, b, j: (b, p * nNp + j, 0))],
            out_specs=pl.BlockSpec((1, 1, C), lambda p, b, j: (b, p, 0)),
        ),
        compiler_params=pltpu.CompilerParams(
            dimension_semantics=("parallel", "parallel", "arbitrary"),
            vmem_limit_bytes=vmem_cap),
        cost_estimate=pl.CostEstimate(
            flops=int(B * N * C), transcendentals=0,
            bytes_accessed=int(B * N * C * itemsize + B * P * C * 4)),
    )(x)

    # ---- tiny per-batch finalize in plain XLA (O(B*C*H), negligible) ----
    xm = sums.sum(axis=1) * (1.0 / float(N))                         # (B, C) mean over seq
    gates = jax.nn.softmax((xm @ wE.T + bE) / t, axis=-1)            # (B, 2)
    gs = (gates * scale).astype(f32)                                 # scale folded into gates
    ab = (0.5 * (xm @ wa_t + bh)).reshape(B, 1, H)                   # 0.5*(mean@wA + bA + bC)
    beff = (scale * (gates[:, 0:1] * bB[None, :]
                     + gates[:, 1:2] * bD[None, :])).reshape(B, 1, C)

    # ---- pass 2: N-tiled streaming main kernel ----
    out = pl.pallas_call(
        _adapter_kernel,
        out_shape=jax.ShapeDtypeStruct((B, N, C), x.dtype),
        grid_spec=pltpu.PrefetchScalarGridSpec(
            num_scalar_prefetch=0,
            grid=(B, nN),
            in_specs=[
                pl.BlockSpec(memory_space=pltpu.MemorySpace.SMEM),    # gate scalars (B, 2)
                pl.BlockSpec((1, TN, C), lambda b, j: (b, j, 0)),     # x
                pl.BlockSpec((C, H), lambda b, j: (0, 0)),            # 0.5*wC  (resident)
                pl.BlockSpec((H, C), lambda b, j: (0, 0)),            # wB dense (resident)
                pl.BlockSpec((H, C), lambda b, j: (0, 0)),            # wD dense (resident)
                pl.BlockSpec((1, 1, H), lambda b, j: (b, 0, 0)),      # ab
                pl.BlockSpec((1, 1, C), lambda b, j: (b, 0, 0)),      # b_eff
            ],
            out_specs=pl.BlockSpec((1, TN, C), lambda b, j: (b, j, 0)),
        ),
        compiler_params=pltpu.CompilerParams(
            dimension_semantics=("parallel", "parallel"),
            vmem_limit_bytes=vmem_cap),
        cost_estimate=pl.CostEstimate(
            flops=int(4 * B * N * C * H + 4 * B * N * C), transcendentals=0,
            bytes_accessed=int(2 * B * N * C * itemsize + (3 * C * H + 2 * B * C + 2 * B) * 4)),
    )(gs, x, wc_half, wb_k, wd_k, ab, beff)

    return out


# ---------------------------------------------------------------------------
# Init + pure-JAX reference (mirrors the PyTorch module exactly, incl. grouped convs)
# ---------------------------------------------------------------------------
def init_raw_params(key, in_features, hidden_dim, groups):
    ks = jax.random.split(key, 10)

    def xavier(k, shape, fan_in, fan_out):
        bound = (6.0 / (fan_in + fan_out)) ** 0.5
        return jax.random.uniform(k, shape, jnp.float32, -bound, bound)

    def small(k, shape):
        return jax.random.uniform(k, shape, jnp.float32, -0.1, 0.1)

    in_pg = hidden_dim // groups
    return {
        "wA": xavier(ks[0], (hidden_dim, in_features), in_features, hidden_dim),
        "bA": small(ks[1], (hidden_dim,)),
        "wC": xavier(ks[2], (hidden_dim, in_features), in_features, hidden_dim),
        "bC": small(ks[3], (hidden_dim,)),
        "wB": xavier(ks[4], (in_features, in_pg), in_pg, in_features),
        "bB": small(ks[5], (in_features,)),
        "wD": xavier(ks[6], (in_features, in_pg), in_pg, in_features),
        "bD": small(ks[7], (in_features,)),
        "wE": xavier(ks[8], (2, in_features), in_features, 2),
        "bE": small(ks[9], (2,)),
    }


def reference(x, raw, scale, t, groups):
    hi = lax.Precision.HIGHEST
    B, N, C = x.shape
    H = raw["wA"].shape[0]
    og, ipg = C // groups, H // groups

    xm = x.mean(axis=1)                                              # (B, C)
    logits = xm @ raw["wE"].T + raw["bE"]                            # (B, 2)
    w = jax.nn.softmax(logits / t, axis=-1)

    a = jnp.einsum("bnc,hc->bnh", x, raw["wA"], precision=hi) + raw["bA"]     # conv_A
    a_mean = a.mean(axis=1, keepdims=True)
    c = jnp.einsum("bnc,hc->bnh", x, raw["wC"], precision=hi) + raw["bC"]     # conv_C
    h = (a_mean + c) * 0.5

    def gconv(hh, wg, bg):
        outs = [jnp.einsum("bnh,oh->bno", hh[..., g * ipg:(g + 1) * ipg],
                           wg[g * og:(g + 1) * og], precision=hi) for g in range(groups)]
        return jnp.concatenate(outs, axis=-1) + bg

    out_b = gconv(h, raw["wB"], raw["bB"])
    out_d = gconv(h, raw["wD"], raw["bD"])
    return (out_b * scale * w[:, 0, None, None]
            + out_d * scale * w[:, 1, None, None] + x)


if __name__ == "__main__":
    scale, t, G = 1.0, 10.0, 2

    # Config 1: tiny shapes, C not a multiple of 128 (masked-lane path), single seq tile.
    B, N, C, H = 2, 8, 32, 8
    kx, kp = jax.random.split(jax.random.PRNGKey(0))
    x = jax.random.normal(kx, (B, N, C), jnp.float32)
    question_mask = jnp.ones((B, N), jnp.float32)    # unused on eval/start_pos path
    raw = init_raw_params(kp, C, H, G)

    out = jax.block_until_ready(
        pia_adapter_attn(x, question_mask, raw, groups=G, scale=scale, t=t))
    ref = reference(x, raw, scale, t, G)
    assert out.shape == (B, N, C)
    assert jnp.allclose(out, ref, atol=2e-2, rtol=1e-2)

    # Config 2: multi-tile sequence (exercises the pass-1 partial-sum split) + C=96.
    B2, N2, C2, H2 = 2, 64, 96, 8
    kx2, kp2 = jax.random.split(jax.random.PRNGKey(1))
    x2 = jax.random.normal(kx2, (B2, N2, C2), jnp.float32)
    raw2 = init_raw_params(kp2, C2, H2, G)
    out2 = jax.block_until_ready(
        pia_adapter_attn(x2, None, raw2, groups=G, scale=scale, t=t, seq_tile=16))
    ref2 = reference(x2, raw2, scale, t, G)
    assert jnp.allclose(out2, ref2, atol=2e-2, rtol=1e-2)

    # Config 3: bf16 streaming input (output dtype follows x; accumulations stay f32).
    x2b = x2.astype(jnp.bfloat16)
    out_b = jax.block_until_ready(
        pia_adapter_attn(x2b, None, raw2, groups=G, scale=scale, t=t, seq_tile=16))
    assert out_b.dtype == jnp.bfloat16
    assert jnp.allclose(out_b.astype(jnp.float32), ref2, atol=2.5e-1, rtol=1e-1)

    print("KERNEL_OK")
</pallas_src>

<mosaic_0001>
module attributes {stable_mosaic.version = 11 : i64} {
  func.func @_seq_sum_kernel(%arg0: i32, %arg1: i32, %arg2: i32, %arg3: memref<1x8x32xf32, #tpu.memory_space<vmem>>, %arg4: memref<1x1x32xf32, #tpu.memory_space<vmem>>) attributes {dimension_semantics = [#tpu.dimension_semantics<parallel>, #tpu.dimension_semantics<parallel>, #tpu.dimension_semantics<arbitrary>], iteration_bounds = array<i64: 1, 2, 1>, scalar_prefetch = 0 : i64, scratch_operands = 0 : i64, tpu.core_type = #tpu.core_type<tc>, window_params = [{transform_indices = @transform_0, window_bounds = array<i64: 1, 8, 32>}, {transform_indices = @transform_1, window_bounds = array<i64: 1, 1, 32>}]} {
    %c0_i32 = arith.constant 0 : i32
    %0 = arith.cmpi eq, %arg2, %c0_i32 : i32
    %1 = arith.extui %0 : i1 to i32
    %c0_i32_0 = arith.constant 0 : i32
    %2 = arith.cmpi ne, %1, %c0_i32_0 : i32
    scf.if %2 {
      %cst_9 = arith.constant 0.000000e+00 : f32
      %13 = vector.broadcast %cst_9 : f32 to vector<1x1x32xf32>
      %c0_10 = arith.constant 0 : index
      %c0_11 = arith.constant 0 : index
      %c0_12 = arith.constant 0 : index
      %14 = vector.load %arg4[%c0_10, %c0_11, %c0_12] : memref<1x1x32xf32, #tpu.memory_space<vmem>>, vector<1x1x32xf32>
      tpu.vector_store %arg4[%c0_10, %c0_11, %c0_12], %13 {strides = array<i32>} : memref<1x1x32xf32, #tpu.memory_space<vmem>>, vector<1x1x32xf32>,
    } else {
    }
    %c0 = arith.constant 0 : index
    %c0_1 = arith.constant 0 : index
    %c0_2 = arith.constant 0 : index
    %3 = vector.load %arg4[%c0, %c0_1, %c0_2] : memref<1x1x32xf32, #tpu.memory_space<vmem>>, vector<1x1x32xf32>
    %4 = vector.shape_cast %3 : vector<1x1x32xf32> to vector<1x32xf32>
    %c0_3 = arith.constant 0 : index
    %c0_4 = arith.constant 0 : index
    %c0_5 = arith.constant 0 : index
    %5 = vector.load %arg3[%c0_3, %c0_4, %c0_5] : memref<1x8x32xf32, #tpu.memory_space<vmem>>, vector<1x8x32xf32>
    %6 = vector.shape_cast %5 : vector<1x8x32xf32> to vector<8x32xf32>
    %cst = arith.constant dense<0.000000e+00> : vector<32xf32>
    %7 = vector.multi_reduction <add>, %6, %cst [0] : vector<8x32xf32> to vector<32xf32>
    %8 = vector.shape_cast %7 : vector<32xf32> to vector<1x32xf32>
    %9 = arith.addf %4, %8 : vector<1x32xf32>
    %c0_6 = arith.constant 0 : index
    %c0_7 = arith.constant 0 : index
    %c0_8 = arith.constant 0 : index
    %10 = vector.load %arg4[%c0_6, %c0_7, %c0_8] : memref<1x1x32xf32, #tpu.memory_space<vmem>>, vector<1x1x32xf32>
    %11 = vector.shape_cast %10 : vector<1x1x32xf32> to vector<1x32xf32>
    %12 = vector.shape_cast %9 : vector<1x32xf32> to vector<1x1x32xf32>
    tpu.vector_store %arg4[%c0_6, %c0_7, %c0_8], %12 {strides = array<i32>} : memref<1x1x32xf32, #tpu.memory_space<vmem>>, vector<1x1x32xf32>,
    return
  }
  func.func @transform_0(%arg0: i32, %arg1: i32, %arg2: i32) -> (i32, i32, i32) {
    %c1_i32 = arith.constant 1 : i32
    %0 = arith.muli %arg0, %c1_i32 : i32
    %1 = arith.addi %0, %arg2 : i32
    %c0_i32 = arith.constant 0 : i32
    %c0_i32_0 = arith.constant 0 : i32
    return %arg1, %1, %c0_i32 : i32, i32, i32
  }
  func.func @transform_1(%arg0: i32, %arg1: i32, %arg2: i32) -> (i32, i32, i32) {
    %c0_i32 = arith.constant 0 : i32
    %c0_i32_0 = arith.constant 0 : i32
    return %arg1, %arg0, %c0_i32 : i32, i32, i32
  }
}

</mosaic_0001>

<bundles_post_ra>
// kernel: tpu_custom_call.1
= control target key start
LH: loop header
LB: loop body
LE: loop exit
PB: predicated region body
PF: predicated region fallthrough
CT: control target
= control target key end

     0   :  { %6 = vsyncpa [#allocation3], 0  ;;  %s648_s0 = inlined_call_operand.hbm [shape: f32[2,8,32], index: 0, kind: input, shape index: {}]   ;;  %s649_s1 = inlined_call_operand.hbm [shape: f32[2,1,32], index: 1, kind: output, shape index: {}]  }
   0x1   :  { %8 = vsyncpa [#allocation3 + $0x1], 0 }
   0x2   :  { %9 = vsyncpa [#allocation4], 0 }
   0x3   :  { %11 = vsyncpa [#allocation4 + $0x1], 0  ;;  %s473_s6 = smov 0   ;;  %s475_s7 = smov 0  }
   0x4   :  { %s477_s8 = smov 0   ;;  %s479_s9 = smov 0  }
   0x5   :  { %s481_s10 = smov 0   ;;  %s483_s11 = smov 0  }
   0x6 LB: > { %s272_s12 = sadd.s32 4294967295, %s458_s11   ;;  %s273_s13 = sadd.s32 4294967294, %s458_s11   ;;  %s458_s11 = sphi %s483_s11, %s17_s11   ;;  %s454_s10 = sphi %s481_s10, %s665_s10   ;;  %s450_s9 = sphi %s479_s9, %s664_s9   ;;  %s446_s8 = sphi %s477_s8, %s663_s8   ;;  %s442_s7 = sphi %s475_s7, %s662_s7   ;;  %s438_s6 = sphi %s473_s6, %s661_s6  }
   0x7   : > { %s32_s14 = sadd.s32 1, %s454_s10  ;;  %s47_s15 = sadd.s32 1, %s446_s8 }
   0x8   : > { %p34_p0 = scmp.ge.s32.totalorder %s32_s14, 2  ;;  %p54_p1 = scmp.ne.s32.totalorder %s446_s8, %s442_s7 }
   0x9   : > { %p55_p2 = scmp.eq.s32.totalorder %s458_s11, 0  ;;  %p60_p3 = scmp.ne.s32.totalorder %s442_s7, %s438_s6 }
   0xa   : > { %s667_s14 = smov (%p34_p0, %s32_s14), 0  ;;  %p61_p5 = scmp.eq.s32.totalorder %s272_s12, 0 }
   0xb   : > { %p514_p4 = por %p55_p2, %p54_p1  ;;  %s42_s17 = ssub.s32 %s454_s10, %s667_s14 }
   0xc   : > { %p86_p6 = scmp.eq.s32.totalorder %s272_s12, 1  ;;  %p45_p7 = scmp.eq.s32.totalorder %s42_s17, 0 }
   0xd   : > { %p520_p8 = por %p61_p5, %p60_p3  ;;  %p92_p10 = scmp.eq.s32.totalorder %s273_s13, 1 }
   0xe   : > { %p524_p9 = por %p86_p6, %p54_p1  ;;  %p295_p13 = scmp.lt.s32.totalorder %s458_s11, 2 }
   0xf   : > { %s529_s20 = scalar_select %p45_p7, %s446_s8, %s47_s15  }
  0x10   : > { %s653_s19 = scalar_select %p524_p9, 1, 0 }
  0x11   : > { %p531_p11 = por %p92_p10, %p60_p3  ;;  %s112_s22 = sand.u32 1, %s446_s8  }
  0x12   : > { %s276_s23 = sshll.u32 %s112_s22, 3  ;;  %s277_s24 = sshll.u32 %s454_s10, 7 }
  0x13   : > { %s654_s21 = scalar_select %p531_p11, 1, 0 }
  0x14   : > { %s542_s27 = scalar_lea.hbm %s648_s0, %s277_s24  ;;  %s116_s28 = scalar_lea.vmem [#allocation2], %s276_s23 }
  0x15   : > { %s125_s29 = sshll.u32 %s116_s28, 4  ;;  %p548_p0 = pnand %p295_p13, %p514_p4  ;;  %s544_s29 = int_to_ptr.vmem [resolvable:$true] %s125_s29 }
  0x16   : > { %s113_s2 = scalar_lea.sflag [#allocation3], %s112_s22  ;;  %s346_s3 = scalar_lea.hbm %s542_s27, 128 }
  0x17   : > { %p347_p3 = scmp.ne.s32.totalorder %s542_s27, %s346_s3  ;;  %p348_p5 = pneg %p548_p0 }
  0x18   : > { %s351_s12 = scalar_lea.hbm %s648_s0, 256  ;;  %p352_p4 = scmp.lt.u32.totalorder %s542_s27, %s648_s0 }
  0x19   : > { %p349_p6 = pnand %p348_p5, %p347_p3  ;;  %p353_p10 = scmp.lt.u32.totalorder %s351_s12, %s346_s3 }
  0x1a   : > { %p355_p12 = scmp.lt.u32.totalorder %s346_s3, %s542_s27 }
  0x1b   : > { %p350_p7 = pneg %p349_p6  ;;  %p354_p13 = por %p353_p10, %p352_p4 }
  0x1d   : > { %p356_p1 = por %p355_p12, %p354_p13 }
  0x1f   : > { %p357_p2 = pnand %p356_p1, %p350_p7 }
  0x21   : > { %360 = shalt.err (!%p357_p2)
}
  0x22   : > { %s361_s16 = scalar_lea.vmem %s544_s29, 128  ;;  %s460_s17 = smov [#allocation2]  }
  0x23   : > { %p362_p3 = scmp.ne.s32.totalorder %s544_s29, %s361_s16  ;;  %s366_s22 = sshll.u32 %s460_s17, 4  ;;  %s367_s22 = int_to_ptr.vmem [resolvable:$false] %s366_s22 }
  0x24   : > { %s368_s23 = scalar_lea.vmem %s367_s22, 256  ;;  %p369_p9 = scmp.lt.s32.totalorder %s544_s29, %s367_s22 }
  0x25   : > { %p364_p6 = pnand %p362_p3, %p348_p5  ;;  %p370_p4 = scmp.lt.s32.totalorder %s368_s23, %s361_s16 }
  0x27   : > { %p365_p11 = pneg %p364_p6  ;;  %p371_p10 = por %p370_p4, %p369_p9 }
  0x29   : > { %p372_p12 = pnand %p371_p10, %p365_p11 }
  0x2b   : > { %375 = shalt.err (!%p372_p12)
}
  0x2c   : > { %290 = dma.hbm_to_vmem [thread:$0]  (!%p548_p0), %s542_s27, 128, %s544_s29, %s113_s2  }
  0x2d   : > { %p656_p1 = scmp.lt.s32.totalorder %s458_s11, 3  ;;  %p657_p2 = scmp.ge.s32.totalorder %s458_s11, 1 }
  0x2f   : > { %p131_p5 = pnand %p657_p2, %p656_p1 }
  0x30   : > { %s584_s24 = sand.u32 (!%p131_p5), 1, %s442_s7  }
  0x31   : > { %134 = sbr.rel (%p131_p5) target bundleno = 87 (0x57), region = 24  ;;  %s279_s25 = sshll.u32 (!%p131_p5), %s584_s24, 3 }
  0x32   : > { %s137_s26 = scalar_lea.sflag (!%p131_p5), [#allocation3], %s584_s24  ;;  %s140_s28 = scalar_lea.vmem (!%p131_p5), [#allocation2], %s279_s25 }
  0x38   : > { %429 = dma.done.wait (%p520_p8), %s137_s26, 128  }
  0x39   : > { %431 = vsyncadd (%p520_p8), %s137_s26, 4294967168  ;;  %vm163_vm0 = vcmask 253952   ;;  %s157_s27 = scalar_lea.vmem [#allocation5], %s584_s24  ;;  %v461_v0 = vmov 0.0   ;;  %vm167_vm1 = vcmask 261120   ;;  %v166_v1 = vld [vmem:[%s140_s28] sm:$0xff] }
  0x3a   : > { %164 = vst.msk [vmem:[%s157_s27] sm:$0x1] %vm163_vm0, %v461_v0  ;;  %v168_v2 = vsel %vm167_vm1, %v166_v1, 0.0  ;;  %s280_s18 = sshll.u32 %s450_s9, 4  ;;  %s192_s29 = sshll.u32 %s157_s27, 4  ;;  %s600_s29 = int_to_ptr.vmem [resolvable:$true] %s192_s29 }
  0x3b   : > { %v169_v3 = vrot.slane %v168_v2, 4  ;;  %s598_s3 = scalar_lea.hbm %s649_s1, %s280_s18  ;;  %s179_s4 = scalar_lea.sflag [#allocation4], %s584_s24 }
  0x3c   : > { %s376_s5 = scalar_lea.vmem %s600_s29, 16  ;;  %p658_p9 = scmp.ne.s32.totalorder %s653_s19, 0 }
  0x3d   : > { %v170_v4 = vadd.f32 %v169_v3, %v168_v2  ;;  %p377_p8 = scmp.ne.s32.totalorder %s600_s29, %s376_s5  ;;  %s462_s9 = smov [#allocation5]  }
  0x3e   : > { %s380_s12 = sshll.u32 %s462_s9, 4  ;;  %s381_s12 = int_to_ptr.vmem [resolvable:$false] %s380_s12 }
  0x3f   : > { %v171_v5 = vrot.slane %v170_v4, 2  ;;  %p378_p11 = pnand %p377_p8, %p658_p9  ;;  %s382_s13 = scalar_lea.vmem %s381_s12, 32 }
  0x40   : > { %p383_p7 = scmp.lt.s32.totalorder %s600_s29, %s381_s12  ;;  %p384_p13 = scmp.lt.s32.totalorder %s382_s13, %s376_s5 }
  0x41   : > { %v172_v6 = vadd.f32 %v171_v5, %v170_v4  ;;  %v165_v8 = vld [vmem:[%s157_s27] sm:$0x1]  ;;  %p379_p0 = pneg %p378_p11 }
  0x42   : > { %p385_p3 = por %p384_p13, %p383_p7 }
  0x43   : > { %v173_v7 = vrot.slane %v172_v6, 1 }
  0x44   : > { %p386_p6 = pnand %p385_p3, %p379_p0 }
  0x45   : > { %v174_v9 = vadd.f32 %v173_v7, %v172_v6 }
  0x47   : > { %v175_v10 = vadd.f32 %v174_v9, %v165_v8 }
  0x49   : > { %177 = vst.msk [vmem:[%s157_s27] sm:$0x1] %vm163_vm0, %v175_v10 }
  0x4a   : > { %389 = shalt.err (!%p386_p6)
}
  0x4b   : > { %s390_s15 = scalar_lea.hbm %s598_s3, 16  ;;  %s394_s22 = scalar_lea.hbm %s649_s1, 32 }
  0x4c   : > { %p391_p4 = scmp.ne.s32.totalorder %s598_s3, %s390_s15  ;;  %p395_p1 = scmp.lt.u32.totalorder %s598_s3, %s649_s1 }
  0x4d   : > { %p396_p2 = scmp.lt.u32.totalorder %s394_s22, %s390_s15  ;;  %p398_p8 = scmp.lt.u32.totalorder %s390_s15, %s598_s3 }
  0x4e   : > { %p392_p10 = pnand %p391_p4, %p658_p9 }
  0x4f   : > { %p397_p5 = por %p396_p2, %p395_p1 }
  0x50   : > { %p393_p12 = pneg %p392_p10 }
  0x51   : > { %p399_p11 = por %p398_p8, %p397_p5 }
  0x53   : > { %p400_p0 = pnand %p399_p11, %p393_p12 }
  0x55   : > { %403 = shalt.err (!%p400_p0)
}
  0x56   : > { %285 = dma.vmem_to_hbm [thread:$0]  (%p658_p9), %s600_s29, 16, %s598_s3, %s179_s4  }
  0x57 PF: > { %s204_s25 = sand.u32 1, %s438_s6   ;;  %p659_p7 = scmp.ne.s32.totalorder %s654_s21, 0 }
  0x58   : > { %p660_p13 = scmp.ge.s32.totalorder %s458_s11, 2  ;;  %s205_s26 = scalar_lea.sflag [#allocation4], %s204_s25 }
  0x5a   : > { %p292_p3 = pnand %p660_p13, %p659_p7 }
  0x5c   : > { %433 = dma.done.wait (!%p292_p3), %s205_s26, 16  }
  0x5d   : > { %435 = vsyncadd (!%p292_p3), %s205_s26, 4294967280  ;;  %s17_s11 = sadd.s32 1, %s458_s11   ;;  %s661_s6 = smov %s442_s7 }
  0x5e   : > { %p14_p6 = scmp.ge.s32.totalorder %s17_s11, 4   ;;  %s662_s7 = smov %s446_s8 }
  0x5f   : > { %s663_s8 = smov %s529_s20  ;;  %s664_s9 = smov %s454_s10 }
  0x60   : > { %s665_s10 = smov %s667_s14  ;;  %16 = sbr.rel (!%p14_p6) target bundleno = 6 (0x6), region = 73 }
  0x67   :  { %209 = vsyncpa [#allocation3], 1 }
  0x68   :  { %211 = vsyncpa [#allocation3 + $0x1], 1 }
  0x69   :  { %212 = vsyncpa [#allocation4], 1 }
  0x6a   :  { %214 = vsyncpa [#allocation4 + $0x1], 1 }

</bundles_post_ra>
